<compile_context>
chip_gen: v7x
topology: tpu7x:2x2x1
jax: 0.10.0
libtpu: 0.0.40
codegen_flags: <defaults>
</compile_context>

<pallas_src>
import jax
import jax.numpy as jnp
from jax import lax
from jax.experimental import pallas as pl
from jax.experimental.pallas import tpu as pltpu


# ------------------------------ tiling helpers ------------------------------

def _pick_tile(dim, target, multiple=8):
    """Largest tile <= target that divides `dim` and is a multiple of
    `multiple` (so the (8,128) block constraint holds); falls back to the full
    dimension, which is always a legal block."""
    if dim <= target:
        return dim
    t = (target // multiple) * multiple
    while t >= multiple:
        if dim % t == 0:
            return t
        t -= multiple
    # TODO(synk): no suitable divisor <= target; a single full-size block is
    # used (correct, but can be VMEM-heavy for very large awkward dims).
    return dim


def _pick_head_group(bh, dh, lane=128):
    """Smallest divisor G of bh with G*dh >= 128 lanes (fills the MXU better
    than a single Dh-wide head)."""
    for g in range(1, bh + 1):
        if bh % g == 0 and g * dh >= lane:
            return g
    return bh


# ----------------------------- Pallas kernels ------------------------------

def _matmul_bias_kernel(x_ref, w_ref, b_ref, o_ref, acc_ref):
    # grid = (M/tm, N/tn, K/tk); K is the reduction ("arbitrary") axis.
    @pl.when(pl.program_id(2) == 0)
    def _():
        acc_ref[...] = jnp.zeros_like(acc_ref)

    acc_ref[...] += jnp.dot(
        x_ref[...], w_ref[...], preferred_element_type=jnp.float32
    )

    @pl.when(pl.program_id(2) == pl.num_programs(2) - 1)
    def _():
        o_ref[...] = (acc_ref[...] + b_ref[...]).astype(o_ref.dtype)


def _flash_attn_kernel(q_ref, k_ref, v_ref, o_ref, m_sc, l_sc, acc_sc):
    # grid = (head-groups, T/tq, S/tkv); kv is the innermost reduction axis.
    # q_ref: (G, tq, Dh), k_ref/v_ref: (G, tkv, Dh), o_ref: (G, tq, Dh).
    kv = pl.program_id(2)

    @pl.when(kv == 0)
    def _():
        m_sc[...] = jnp.full(m_sc.shape, -jnp.inf, dtype=jnp.float32)
        l_sc[...] = jnp.zeros_like(l_sc)
        acc_sc[...] = jnp.zeros_like(acc_sc)

    # MXU operands in bf16 (no-op cast when inputs are already bf16); all
    # accumulation and softmax statistics stay f32.
    q = q_ref[...].astype(jnp.bfloat16)
    k = k_ref[...].astype(jnp.bfloat16)
    v = v_ref[...].astype(jnp.bfloat16)

    # s[g,t,s] = sum_d q[g,t,d] * k[g,s,d]  -- transposed contraction, no k.T.
    s = lax.dot_general(
        q, k,
        dimension_numbers=(((2,), (2,)), ((0,), (0,))),
        preferred_element_type=jnp.float32,
    )                                                      # (G, tq, tkv) f32

    m_prev = m_sc[...]
    m_new = jnp.maximum(m_prev, jnp.max(s, axis=-1, keepdims=True))
    alpha = jnp.exp(m_prev - m_new)
    p = jnp.exp(s - m_new)                                 # f32 (VPU/EUP, safe on v5e)
    l_sc[...] = alpha * l_sc[...] + jnp.sum(p, axis=-1, keepdims=True)

    pv = lax.dot_general(
        p.astype(jnp.bfloat16), v,
        dimension_numbers=(((2,), (1,)), ((0,), (0,))),
        preferred_element_type=jnp.float32,
    )                                                      # (G, tq, Dh) f32
    acc_sc[...] = alpha * acc_sc[...] + pv
    m_sc[...] = m_new

    @pl.when(kv == pl.num_programs(2) - 1)
    def _():
        out = acc_sc[...] * pl.reciprocal(l_sc[...], approx=True)
        o_ref[...] = out.astype(o_ref.dtype)


# ------------------------------ JAX wrappers --------------------------------

_VMEM_LIMIT = 64 * 1024 * 1024  # generous cap; actual usage stays far below


def pallas_linear(x2d, w, b, out_dtype=jnp.float32, tm=512, tn=1024, tk=512):
    """Tiled (M,K)@(K,N)+b.  w is (in, out), i.e. already torch_weight.T."""
    M, K = x2d.shape
    K2, N = w.shape
    assert K == K2
    tm = _pick_tile(M, tm, multiple=8)
    tn = _pick_tile(N, tn, multiple=128)
    tk = _pick_tile(K, tk, multiple=128)
    assert M % tm == 0 and N % tn == 0 and K % tk == 0
    b2d = b.reshape(1, N).astype(jnp.float32)

    return pl.pallas_call(
        _matmul_bias_kernel,
        out_shape=jax.ShapeDtypeStruct((M, N), out_dtype),
        grid_spec=pltpu.PrefetchScalarGridSpec(
            num_scalar_prefetch=0,
            grid=(M // tm, N // tn, K // tk),
            in_specs=[
                pl.BlockSpec((tm, tk), lambda i, j, k: (i, k)),
                pl.BlockSpec((tk, tn), lambda i, j, k: (k, j)),
                pl.BlockSpec((1, tn), lambda i, j, k: (0, j)),
            ],
            out_specs=pl.BlockSpec((tm, tn), lambda i, j, k: (i, j)),
            scratch_shapes=[pltpu.VMEM((tm, tn), jnp.float32)],
        ),
        compiler_params=pltpu.CompilerParams(
            dimension_semantics=("parallel", "parallel", "arbitrary"),
            vmem_limit_bytes=_VMEM_LIMIT,
        ),
    )(x2d, w, b2d)


def pallas_flash_attention(q, k, v, out_dtype=jnp.float32,
                           tq_target=256, tkv_target=512):
    """q: (BH, T, Dh) (pre-scaled), k/v: (BH, S, Dh) -> (BH, T, Dh)."""
    BH, T, Dh = q.shape
    S = k.shape[1]
    G = _pick_head_group(BH, Dh)
    NG = BH // G
    tq = _pick_tile(T, tq_target, multiple=8)
    tkv = _pick_tile(S, tkv_target, multiple=8)
    assert T % tq == 0 and S % tkv == 0

    return pl.pallas_call(
        _flash_attn_kernel,
        out_shape=jax.ShapeDtypeStruct((BH, T, Dh), out_dtype),
        grid_spec=pltpu.PrefetchScalarGridSpec(
            num_scalar_prefetch=0,
            grid=(NG, T // tq, S // tkv),
            in_specs=[
                pl.BlockSpec((G, tq, Dh), lambda g, qt, kv: (g, qt, 0)),
                # TODO(synk): on v5e, pipeline_mode=pl.Buffered(3) here if
                # profiling shows exposed K/V DMA (blocks are tiny).
                pl.BlockSpec((G, tkv, Dh), lambda g, qt, kv: (g, kv, 0)),
                pl.BlockSpec((G, tkv, Dh), lambda g, qt, kv: (g, kv, 0)),
            ],
            out_specs=pl.BlockSpec((G, tq, Dh), lambda g, qt, kv: (g, qt, 0)),
            scratch_shapes=[
                pltpu.VMEM((G, tq, 1), jnp.float32),   # running max m
                pltpu.VMEM((G, tq, 1), jnp.float32),   # running denom l
                pltpu.VMEM((G, tq, Dh), jnp.float32),  # output accumulator
            ],
        ),
        compiler_params=pltpu.CompilerParams(
            dimension_semantics=("parallel", "parallel", "arbitrary"),
            vmem_limit_bytes=_VMEM_LIMIT,
        ),
    )(q, k, v)


class PallasBartAttention:
    """Mirrors Attention.forward for the self-attention default path
    (layer_state=None, attn_mask=None, key_padding_mask=None, dropout=0.0)."""

    def __init__(self, embed_dim, num_heads, key, compute_dtype=jnp.bfloat16):
        # bf16 MXU operands by default on all generations (v5e/v6e/v7x MXUs are
        # bf16-native); f32 accumulation is kept inside every kernel.
        assert embed_dim % num_heads == 0
        self.embed_dim = embed_dim
        self.num_heads = num_heads
        self.head_dim = embed_dim // num_heads
        self.scaling = self.head_dim ** (-0.5)
        self.compute_dtype = compute_dtype

        keys = jax.random.split(key, 8)
        init = lambda k, shape: (
            jax.random.normal(k, shape, jnp.float32) * (1.0 / jnp.sqrt(embed_dim))
        )
        # Master f32 params, stored as (in, out) so kernels do x @ W directly.
        self._q_w = init(keys[0], (embed_dim, embed_dim))
        self._k_w = init(keys[1], (embed_dim, embed_dim))
        self._v_w = init(keys[2], (embed_dim, embed_dim))
        self._o_w = init(keys[3], (embed_dim, embed_dim))
        self._q_b = init(keys[4], (embed_dim,))
        self._k_b = init(keys[5], (embed_dim,))
        self._v_b = init(keys[6], (embed_dim,))
        self._o_b = init(keys[7], (embed_dim,))

        # Fused QKV weights with the query scaling folded in (free at init).
        self.qkv_w = jnp.concatenate(
            [self._q_w * self.scaling, self._k_w, self._v_w], axis=1
        ).astype(compute_dtype)                       # (E, 3E)
        self.qkv_b = jnp.concatenate(
            [self._q_b * self.scaling, self._k_b, self._v_b]
        )                                             # (3E,) f32
        self.o_w = self._o_w.astype(compute_dtype)
        self.o_b = self._o_b                          # f32

    def __call__(self, query):
        # TODO(synk): attn_mask / key_padding_mask / incremental-decoding cache
        # and output_attentions paths are not implemented (defaults exercise
        # the no-mask self-attention path).
        T, B, E = query.shape
        H, Dh = self.num_heads, self.head_dim
        assert E == self.embed_dim

        x2d = query.reshape(T * B, E).astype(self.compute_dtype)

        # Fused QKV projection (scaling already folded into the Q columns).
        qkv = pallas_linear(x2d, self.qkv_w, self.qkv_b,
                            out_dtype=self.compute_dtype)          # (T*B, 3E)

        # (T*B, 3E) -> (3, B*H, T, Dh) in a single XLA transpose.
        # TODO(synk): the head split/merge could be folded into the attention
        # BlockSpec index_maps to drop these two HBM passes entirely.
        qkv = (qkv.reshape(T, B, 3, H, Dh)
                  .transpose(2, 1, 3, 0, 4)
                  .reshape(3, B * H, T, Dh))
        q, k, v = qkv[0], qkv[1], qkv[2]

        attn = pallas_flash_attention(q, k, v, out_dtype=self.compute_dtype)

        # (B*H, T, Dh) -> (T, B, H, Dh) -> (T*B, E)
        attn = (attn.reshape(B, H, T, Dh)
                    .transpose(2, 0, 1, 3)
                    .reshape(T * B, E))

        out = pallas_linear(attn, self.o_w, self.o_b, out_dtype=jnp.float32)
        return out.reshape(T, B, E)

    # Pure-JAX f32 reference (mirrors the PyTorch forward) for a sanity check.
    def reference(self, query):
        T, B, E = query.shape
        H, Dh = self.num_heads, self.head_dim
        x2d = query.reshape(T * B, E)
        q = (x2d @ self._q_w + self._q_b) * self.scaling
        k = x2d @ self._k_w + self._k_b
        v = x2d @ self._v_w + self._v_b

        def shape(x):
            return x.reshape(T, B * H, Dh).transpose(1, 0, 2)

        q, k, v = shape(q), shape(k), shape(v)
        s = jnp.einsum("btd,bsd->bts", q, k)
        p = jax.nn.softmax(s, axis=-1)
        a = jnp.einsum("bts,bsd->btd", p, v)
        a = a.transpose(1, 0, 2).reshape(T * B, E)
        return (a @ self._o_w + self._o_b).reshape(T, B, E)


if __name__ == "__main__":
    T, B, E, H = 8, 2, 32, 4
    key = jax.random.PRNGKey(0)
    k_param, k_x = jax.random.split(key)

    attn = PallasBartAttention(embed_dim=E, num_heads=H, key=k_param)
    query = jax.random.normal(k_x, (T, B, E), jnp.float32)

    out = attn(query)
    out = jax.block_until_ready(out)

    ref = attn.reference(query)
    assert out.shape == (T, B, E)
    # bf16 MXU operands + approx reciprocal -> loose tolerance vs f32 reference.
    assert jnp.allclose(out, ref, atol=5e-2, rtol=5e-2), "mismatch vs reference"

    print("KERNEL_OK")
</pallas_src>

<mosaic_0001>
module attributes {stable_mosaic.version = 11 : i64} {
  func.func @_matmul_bias_kernel(%arg0: i32, %arg1: i32, %arg2: i32, %arg3: memref<16x32xbf16, #tpu.memory_space<vmem>>, %arg4: memref<32x96xbf16, #tpu.memory_space<vmem>>, %arg5: memref<1x96xf32, #tpu.memory_space<vmem>>, %arg6: memref<16x96xbf16, #tpu.memory_space<vmem>>, %arg7: memref<16x96xf32, #tpu.memory_space<vmem>>) attributes {dimension_semantics = [#tpu.dimension_semantics<parallel>, #tpu.dimension_semantics<parallel>, #tpu.dimension_semantics<arbitrary>], iteration_bounds = array<i64: 1, 1, 1>, scalar_prefetch = 0 : i64, scratch_operands = 1 : i64, tpu.core_type = #tpu.core_type<tc>, window_params = [{transform_indices = @transform_0, window_bounds = array<i64: 16, 32>}, {transform_indices = @transform_1, window_bounds = array<i64: 32, 96>}, {transform_indices = @transform_2, window_bounds = array<i64: 1, 96>}, {transform_indices = @transform_3, window_bounds = array<i64: 16, 96>}]} {
    %c0_i32 = arith.constant 0 : i32
    %0 = arith.cmpi eq, %arg2, %c0_i32 : i32
    %1 = arith.extui %0 : i1 to i32
    %c0_i32_0 = arith.constant 0 : i32
    %2 = arith.cmpi ne, %1, %c0_i32_0 : i32
    scf.if %2 {
      %cst_10 = arith.constant 0.000000e+00 : f32
      %12 = vector.broadcast %cst_10 : f32 to vector<16x96xf32>
      %c0_11 = arith.constant 0 : index
      %c0_12 = arith.constant 0 : index
      %13 = vector.load %arg7[%c0_11, %c0_12] : memref<16x96xf32, #tpu.memory_space<vmem>>, vector<16x96xf32>
      tpu.vector_store %arg7[%c0_11, %c0_12], %12 {strides = array<i32>} : memref<16x96xf32, #tpu.memory_space<vmem>>, vector<16x96xf32>,
    } else {
    }
    %c0 = arith.constant 0 : index
    %c0_1 = arith.constant 0 : index
    %3 = vector.load %arg7[%c0, %c0_1] : memref<16x96xf32, #tpu.memory_space<vmem>>, vector<16x96xf32>
    %c0_2 = arith.constant 0 : index
    %c0_3 = arith.constant 0 : index
    %4 = vector.load %arg3[%c0_2, %c0_3] : memref<16x32xbf16, #tpu.memory_space<vmem>>, vector<16x32xbf16>
    %c0_4 = arith.constant 0 : index
    %c0_5 = arith.constant 0 : index
    %5 = vector.load %arg4[%c0_4, %c0_5] : memref<32x96xbf16, #tpu.memory_space<vmem>>, vector<32x96xbf16>
    %cst = arith.constant dense<0.000000e+00> : vector<16x96xf32>
    %6 = tpu.matmul %4, %5, %cst {dimension_numbers = #tpu.dot_dimension_numbers<[1], [0], [0], [1], [0, 0, 1, 1], [], []>} : vector<16x32xbf16>, vector<32x96xbf16>, vector<16x96xf32> -> vector<16x96xf32>
    %7 = arith.addf %3, %6 : vector<16x96xf32>
    %c0_6 = arith.constant 0 : index
    %c0_7 = arith.constant 0 : index
    %8 = vector.load %arg7[%c0_6, %c0_7] : memref<16x96xf32, #tpu.memory_space<vmem>>, vector<16x96xf32>
    tpu.vector_store %arg7[%c0_6, %c0_7], %7 {strides = array<i32>} : memref<16x96xf32, #tpu.memory_space<vmem>>, vector<16x96xf32>,
    %c0_i32_8 = arith.constant 0 : i32
    %9 = arith.cmpi eq, %arg2, %c0_i32_8 : i32
    %10 = arith.extui %9 : i1 to i32
    %c0_i32_9 = arith.constant 0 : i32
    %11 = arith.cmpi ne, %10, %c0_i32_9 : i32
    scf.if %11 {
      %c0_10 = arith.constant 0 : index
      %c0_11 = arith.constant 0 : index
      %12 = vector.load %arg7[%c0_10, %c0_11] : memref<16x96xf32, #tpu.memory_space<vmem>>, vector<16x96xf32>
      %c0_12 = arith.constant 0 : index
      %c0_13 = arith.constant 0 : index
      %13 = vector.load %arg5[%c0_12, %c0_13] : memref<1x96xf32, #tpu.memory_space<vmem>>, vector<1x96xf32>
      %14 = vector.broadcast %13 : vector<1x96xf32> to vector<16x96xf32>
      %15 = arith.addf %12, %14 : vector<16x96xf32>
      %16 = arith.truncf %15 : vector<16x96xf32> to vector<16x96xbf16>
      %c0_14 = arith.constant 0 : index
      %c0_15 = arith.constant 0 : index
      %17 = vector.load %arg6[%c0_14, %c0_15] : memref<16x96xbf16, #tpu.memory_space<vmem>>, vector<16x96xbf16>
      tpu.vector_store %arg6[%c0_14, %c0_15], %16 {strides = array<i32>} : memref<16x96xbf16, #tpu.memory_space<vmem>>, vector<16x96xbf16>,
    } else {
    }
    return
  }
  func.func @transform_0(%arg0: i32, %arg1: i32, %arg2: i32) -> (i32, i32) {
    %c0_i32 = arith.constant 0 : i32
    return %arg0, %arg2 : i32, i32
  }
  func.func @transform_1(%arg0: i32, %arg1: i32, %arg2: i32) -> (i32, i32) {
    %c0_i32 = arith.constant 0 : i32
    return %arg2, %arg1 : i32, i32
  }
  func.func @transform_2(%arg0: i32, %arg1: i32, %arg2: i32) -> (i32, i32) {
    %c0_i32 = arith.constant 0 : i32
    %c0_i32_0 = arith.constant 0 : i32
    return %c0_i32, %arg1 : i32, i32
  }
  func.func @transform_3(%arg0: i32, %arg1: i32, %arg2: i32) -> (i32, i32) {
    %c0_i32 = arith.constant 0 : i32
    return %arg0, %arg1 : i32, i32
  }
}

</mosaic_0001>

<bundles_post_ra>
// kernel: tpu_custom_call.1
= control target key start
LH: loop header
LB: loop body
LE: loop exit
PB: predicated region body
PF: predicated region fallthrough
CT: control target
= control target key end

     0   :  { %8 = vsyncpa [#allocation4], 0  ;;  %s401_s0 = inlined_call_operand.hbm [shape: bf16[16,32], index: 0, kind: input, shape index: {}]   ;;  %s402_s1 = inlined_call_operand.hbm [shape: bf16[32,96], index: 1, kind: input, shape index: {}]   ;;  %s403_s2 = inlined_call_operand.hbm [shape: f32[1,96], index: 2, kind: input, shape index: {}]   ;;  %s404_s3 = inlined_call_operand.hbm [shape: bf16[16,96], index: 3, kind: output, shape index: {}]  }
   0x1   :  { %9 = vsyncpa [#allocation7], 0 }
   0x2   :  { %10 = vsyncpa [#allocation5], 0  ;;  %s305_s12 = smov [#allocation6]   ;;  %s306_s14 = smov [#allocation3]  }
   0x3   :  { %s28_s13 = sshll.u32 %s305_s12, 4  ;;  %s16_s15 = sshll.u32 %s306_s14, 4  ;;  %s29_s13 = int_to_ptr.vmem [resolvable:$true] %s28_s13  ;;  %s333_s15 = int_to_ptr.vmem [resolvable:$true] %s16_s15 }
   0x4   :  { %s211_s18 = scalar_lea.hbm %s402_s1, 256 }
   0x5   :  { %p212_p0 = scmp.ne.s32.totalorder %s402_s1, %s211_s18  ;;  %p215_p1 = scmp.lt.u32.totalorder %s211_s18, %s402_s1 }
   0x7   :  { %p217_p2 = pnand %p215_p1, %p212_p0 }
   0x9   :  { %220 = shalt.err (!%p217_p2)
}
   0xa   :  { %s221_s23 = scalar_lea.vmem %s29_s13, 256  ;;  %p226_p4 = scmp.lt.s32.totalorder %s29_s13, %s29_s13 }
   0xb   :  { %p222_p3 = scmp.ne.s32.totalorder %s29_s13, %s221_s23  ;;  %p227_p5 = scmp.lt.s32.totalorder %s221_s23, %s221_s23 }
   0xd   :  { %p228_p6 = por %p227_p5, %p226_p4 }
   0xf   :  { %p229_p7 = pnand %p228_p6, %p222_p3 }
  0x11   :  { %232 = shalt.err (!%p229_p7)
}
  0x12   :  { %s307_s24 = smov 64   ;;  %s308_s25 = smov 4  }
  0x13   :  { %34 = dma.hbm_to_vmem [thread:$0]  %s402_s1, 256, %s29_s13, [#allocation7], %s307_s24, %s307_s24, %s308_s25  }
  0x14   :  { %s233_s30 = scalar_lea.hbm %s401_s0, 128 }
  0x15   :  { %p234_p8 = scmp.ne.s32.totalorder %s401_s0, %s233_s30  ;;  %p237_p9 = scmp.lt.u32.totalorder %s233_s30, %s401_s0 }
  0x17   :  { %p239_p10 = pnand %p237_p9, %p234_p8 }
  0x19   :  { %242 = shalt.err (!%p239_p10)
}
  0x1a   :  { %s243_s8 = scalar_lea.vmem %s333_s15, 128  ;;  %p248_p12 = scmp.lt.s32.totalorder %s333_s15, %s333_s15 }
  0x1b   :  { %p244_p11 = scmp.ne.s32.totalorder %s333_s15, %s243_s8  ;;  %p249_p13 = scmp.lt.s32.totalorder %s243_s8, %s243_s8 }
  0x1d   :  { %p250_p0 = por %p249_p13, %p248_p12 }
  0x1f   :  { %p251_p1 = pnand %p250_p0, %p244_p11 }
  0x21   :  { %254 = shalt.err (!%p251_p1)
}
  0x22   :  { %22 = dma.hbm_to_vmem [thread:$0]  %s401_s0, 128, %s333_s15, [#allocation4], %s307_s24, %s307_s24, %s308_s25  }
  0x23   :  { %s309_s10 = smov [#allocation8]   ;;  %s255_s14 = scalar_lea.hbm %s403_s2, 16 }
  0x24   :  { %s41_s11 = sshll.u32 %s309_s10, 4  ;;  %p256_p2 = scmp.ne.s32.totalorder %s403_s2, %s255_s14  ;;  %s42_s11 = int_to_ptr.vmem [resolvable:$true] %s41_s11 }
  0x25   :  { %p259_p3 = scmp.lt.u32.totalorder %s255_s14, %s403_s2 }
  0x27   :  { %p261_p4 = pnand %p259_p3, %p256_p2 }
  0x29   :  { %264 = shalt.err (!%p261_p4)
}
  0x2a   :  { %s265_s20 = scalar_lea.vmem %s42_s11, 16  ;;  %s269_s0 = scalar_lea.vmem %s42_s11, 32 }
  0x2b   :  { %p266_p5 = scmp.ne.s32.totalorder %s42_s11, %s265_s20  ;;  %p270_p6 = scmp.lt.s32.totalorder %s42_s11, %s42_s11 }
  0x2c   :  { %p271_p7 = scmp.lt.s32.totalorder %s269_s0, %s265_s20 }
  0x2e   :  { %p272_p8 = por %p271_p7, %p270_p6 }
  0x30   :  { %p273_p9 = pnand %p272_p8, %p266_p5 }
  0x32   :  { %276 = shalt.err (!%p273_p9)
}
  0x33   :  { %44 = dma.hbm_to_vmem [thread:$0]  %s403_s2, 16, %s42_s11, [#allocation7]  }
  0x34   :  { %299 = dma.done.wait [#allocation4], 128  }
  0x35   :  { %300 = vsyncadd [#allocation4], 4294967168 }
  0x36   :  { %301 = dma.done.wait [#allocation7], 272  }
  0x37   :  { %302 = vsyncadd [#allocation7], 4294967024  ;;  %vm59_vm0 = vcmask 785408   ;;  %v310_v0 = vmov 0.0   ;;  %vm311_vm1 = vmmov 0   ;;  %v208_v1 = vld [vmem:[#allocation6] sm:$0xff]  }
  0x38   :  { %60 = vst.msk [vmem:[#allocation2] sm:$0xff] %vm59_vm0, %v310_v0  ;;  %61 = vst.msk [vmem:[#allocation2 + $0x8] sm:$0xff] %vm59_vm0, %v310_v0  ;;  %192 = vmatprep.subr.bf16.mxu0 %v310_v0  ;;  %196 = vmatprep.mubr.msk.bf16.mxu0 %vm311_vm1, %v310_v0  ;;  %v209_v2 = vld [vmem:[#allocation6 + $0x8] sm:$0xff]   ;;  %v210_v3 = vld [vmem:[#allocation3] sm:$0xff]   ;;  %vm87_vm2 = vcmask 261120   ;;  %vm159_vm3 = vcmask 781312  }
  0x39   :  { %193 = vmatpush3.bf16.msra.mxu0 %v208_v1  ;;  %v184_v12 = vld [vmem:[#allocation8] ss:$0 sm:$0xff]  ;;  %s312_s2 = smov [#allocation9]  }
  0x3a   :  { %194 = vmatprep.subr.bf16.mxu0 %v310_v0  ;;  %s167_s22 = sshll.u32 %s312_s2, 4  ;;  %s168_s22 = int_to_ptr.vmem [resolvable:$true] %s167_s22 }
  0x3b   :  { %s277_s23 = scalar_lea.vmem %s168_s22, 128  ;;  %p282_p11 = scmp.lt.s32.totalorder %s168_s22, %s168_s22 }
  0x3c   :  { %p278_p10 = scmp.ne.s32.totalorder %s168_s22, %s277_s23  ;;  %p283_p12 = scmp.lt.s32.totalorder %s277_s23, %s277_s23 }
  0x3d   :  { %195 = vmatpush3.bf16.msra.mxu0 %v209_v2 }
  0x3e   :  { %p284_p13 = por %p283_p12, %p282_p11 }
  0x3f   :  { %v62_v4 = vld [vmem:[#allocation2] sm:$0xff]  ;;  %v63_v6 = vld [vmem:[#allocation2 + $0x8] sm:$0xff] }
  0x40   :  { %197 = vmatmul.mubr.msk.bf16.vlgmr.msra.gmra.mrb[0].mxu0 %vm87_vm2, %v210_v3  ;;  %p285_p0 = pnand %p284_p13, %p278_p10 }
 0x113   :  { %v125_v5 = vpop.f32.mrb[0].mxu0 }
 0x114   :  { %v132_v7 = vadd.f32 %v125_v5, %v62_v4  ;;  %v198_v8 = vpop.f32.mrb[1].mxu0 }
 0x115   :  { %v128_v9 = vpop.f32.mrb[2].mxu0 }
 0x116   :  { %135 = vst.msk [vmem:[#allocation2] sm:$0xff] %vm59_vm0, %v132_v7  ;;  %v133_v10 = vadd.f32 %v128_v9, %v63_v6  ;;  %v199_v11 = vpop.f32.mrb[3].mxu0 }
 0x118   :  { %136 = vst.msk [vmem:[#allocation2 + $0x8] sm:$0xff] %vm59_vm0, %v133_v10 }
 0x11d   :  { %v140_v13 = vld [vmem:[#allocation2] sm:$0xff] }
 0x11e   :  { %v149_v14 = vadd.f32 %v184_v12, %v140_v13 }
 0x11f   :  { %v141_v15 = vld [vmem:[#allocation2 + $0x8] sm:$0xff] }
 0x120   :  { %v150_v16 = vadd.f32 %v184_v12, %v141_v15  ;;  %v187_v17 = vpack.c.bf16 %v149_v14, %v149_v14 }
 0x122   :  { %v188_v18 = vpack.c.bf16 %v150_v16, %v150_v16  ;;  %160 = vst.msk [vmem:[#allocation9] sm:$0xf] %vm159_vm3, %v187_v17 }
 0x124   :  { %161 = vst.msk [vmem:[#allocation9 + $0x4] sm:$0xf] %vm159_vm3, %v188_v18 }
 0x125   :  { %288 = shalt.err (!%p285_p0)
}
 0x126   :  { %s289_s28 = scalar_lea.hbm %s404_s3, 128 }
 0x127   :  { %p290_p1 = scmp.ne.s32.totalorder %s404_s3, %s289_s28  ;;  %p293_p2 = scmp.lt.u32.totalorder %s289_s28, %s404_s3 }
 0x129   :  { %p295_p3 = pnand %p293_p2, %p290_p1 }
 0x12b   :  { %298 = shalt.err (!%p295_p3)
}
 0x12c   :  { %173 = dma.vmem_to_hbm [thread:$0]  %s168_s22, 128, %s404_s3, [#allocation5], %s307_s24, %s307_s24, %s308_s25  }
 0x12d   :  { %303 = dma.done.wait [#allocation5], 128  }
 0x12e   :  { %304 = vsyncadd [#allocation5], 4294967168 }
 0x12f   :  { %177 = vsyncpa [#allocation4], 1 }
 0x130   :  { %178 = vsyncpa [#allocation7], 1 }
 0x131   :  { %179 = vsyncpa [#allocation5], 1 }

</bundles_post_ra>
